<compile_context>
chip_gen: v7x
topology: tpu7x:2x2x1
jax: 0.10.0
libtpu: 0.0.40
codegen_flags: <defaults>
</compile_context>

<pallas_src>
import jax
import jax.numpy as jnp
from jax.experimental import pallas as pl
from jax.experimental.pallas import tpu as pltpu


def _partial_sums_kernel(x_ref, y_ref, o_ref):
    """Per-block partial sums: Sx, Sy, Sxy, Sxx, Syy -> lanes 0..4 of o_ref."""
    tr, nl = x_ref.shape
    groups, rem = divmod(tr, 8)

    def load(ref, start, size):
        return ref[pl.ds(start, size), :].astype(jnp.float32)

    if groups > 0:
        # Fold sublane groups first: the carry (five (8, nl) slabs) stays in
        # vregs, so per input-vreg pair we do ~2 loads + 3 muls + 5 adds and
        # zero accumulator VMEM traffic.
        # TODO(synk): if profiling on v7x shows VALU saturation for bf16
        # inputs, offload this row-fold to the idle MXU (ones @ block).
        def body(k, carry):
            fx, fy, fxy, fxx, fyy = carry
            r0 = pl.multiple_of(k * 8, 8)
            xs = load(x_ref, r0, 8)
            ys = load(y_ref, r0, 8)
            return (fx + xs, fy + ys, fxy + xs * ys,
                    fxx + xs * xs, fyy + ys * ys)

        zero = jnp.zeros((8, nl), jnp.float32)
        fx, fy, fxy, fxx, fyy = jax.lax.fori_loop(
            0, groups, body, (zero, zero, zero, zero, zero))
        # Cross-lane reduces happen once per block (XLU; off the streaming path).
        sx, sy, sxy = jnp.sum(fx), jnp.sum(fy), jnp.sum(fxy)
        sxx, syy = jnp.sum(fxx), jnp.sum(fyy)
    else:
        sx = sy = sxy = sxx = syy = jnp.float32(0.0)

    if rem:
        xs = load(x_ref, groups * 8, rem)
        ys = load(y_ref, groups * 8, rem)
        sx = sx + jnp.sum(xs)
        sy = sy + jnp.sum(ys)
        sxy = sxy + jnp.sum(xs * ys)
        sxx = sxx + jnp.sum(xs * xs)
        syy = syy + jnp.sum(ys * ys)

    # Lane-dense partials row: value i lives in lane i (replicated over sublanes).
    lane = jax.lax.broadcasted_iota(jnp.int32, o_ref.shape, o_ref.ndim - 1)
    o_ref[...] = (jnp.where(lane == 0, sx, 0.0)
                  + jnp.where(lane == 1, sy, 0.0)
                  + jnp.where(lane == 2, sxy, 0.0)
                  + jnp.where(lane == 3, sxx, 0.0)
                  + jnp.where(lane == 4, syy, 0.0))


_LANE_CANDIDATES = (512, 256, 128)      # <=512 keeps the fold carry in vregs
_TARGET_BLOCK_BYTES = 2 * 1024 * 1024   # ~2 MiB f32 per input block
_MIN_TILE_ROWS = 64                     # reject sliver tiles in the no-pad search


def _round_up(x, m):
    return ((x + m - 1) // m) * m


def _pick_geometry(n):
    """Choose (lanes, tile_rows, rows, padded_len) for flattened length n."""
    # Preferred: a lane width that divides n exactly -> zero-copy reshape,
    # no padded HBM materialization of the inputs.
    for lanes in _LANE_CANDIDATES:
        if n % lanes:
            continue
        rows = n // lanes
        max_rows = max(8, _TARGET_BLOCK_BYTES // (lanes * 4))
        if rows <= max_rows:
            return lanes, rows, rows, n            # one block, zero-copy
        tr = max_rows - max_rows % 8
        while tr >= _MIN_TILE_ROWS:
            if rows % tr == 0:
                return lanes, tr, rows, n          # multi-block, zero-copy
            tr -= 8
    # Fallback: zero-pad the flat signal (extra HBM copy).  Padding zeros
    # contribute 0 to every partial sum; true n enters only the epilogue.
    # TODO(synk): a masked ragged last block would avoid this copy as well.
    lanes = 512 if n >= 512 else 128
    max_rows = max(8, _TARGET_BLOCK_BYTES // (lanes * 4))
    rows_needed = -(-n // lanes)
    if rows_needed <= max_rows:
        tile_rows = _round_up(rows_needed, 8)
        rows = tile_rows
    else:
        tile_rows = max_rows - max_rows % 8
        rows = _round_up(rows_needed, tile_rows)
    return lanes, tile_rows, rows, rows * lanes


def neg_pearson_loss_mtts(predictions, targets):
    """JAX/Pallas equivalent of neg_Pearson_Loss_MTTS (returns a scalar)."""
    # Glue: squeeze + flatten (matches torch.squeeze + .view(-1)).  Keep the
    # native dtype; the kernel casts per-tile so bf16 streams at half bytes.
    p = jnp.squeeze(predictions).reshape(-1)
    t = jnp.squeeze(targets).reshape(-1)
    n = p.shape[0]
    assert t.shape[0] == n, "predictions/targets must have the same length"

    lanes, tile_rows, rows, padded = _pick_geometry(n)
    if padded == n:
        x2 = p.reshape(rows, lanes)                 # pure bitcast, no HBM copy
        y2 = t.reshape(rows, lanes)
    else:
        x2 = jnp.pad(p, (0, padded - n)).reshape(rows, lanes)
        y2 = jnp.pad(t, (0, padded - n)).reshape(rows, lanes)

    num_blocks = rows // tile_rows
    partials = pl.pallas_call(
        _partial_sums_kernel,
        out_shape=jax.ShapeDtypeStruct((num_blocks, 8, 128), jnp.float32),
        grid=(num_blocks,),
        in_specs=[
            # TODO(synk): add pipeline_mode=pl.Buffered(3) if a trace still
            # shows exposed DMA between the short per-block steps.
            pl.BlockSpec((tile_rows, lanes), lambda i: (i, 0)),
            pl.BlockSpec((tile_rows, lanes), lambda i: (i, 0)),
        ],
        out_specs=pl.BlockSpec((1, 8, 128), lambda i: (i, 0, 0)),
        compiler_params=pltpu.CompilerParams(
            # Independent per-block partials -> fully parallel grid axis
            # (shards the mem-bound stream across both TensorCores on v7x).
            dimension_semantics=("parallel",),
            vmem_limit_bytes=32 * 1024 * 1024,
        ),
    )(x2, y2)

    # Combine partials + Pearson formula in plain JAX (n stays a host scalar).
    sums = partials[:, 0, :].sum(axis=0)
    sum_x, sum_y, sum_xy = sums[0], sums[1], sums[2]
    sum_x2, sum_y2 = sums[3], sums[4]
    tt = jnp.float32(n)
    num = tt * sum_xy - sum_x * sum_y
    # Matches PyTorch semantics exactly (NaN for zero-variance signals).
    den = jnp.sqrt((tt * sum_x2 - sum_x * sum_x)
                   * (tt * sum_y2 - sum_y * sum_y))
    return 1.0 - num / den


if __name__ == "__main__":
    key = jax.random.PRNGKey(0)
    k1, k2 = jax.random.split(key)
    # Small shapes consistent with the module: (batch=2, seq=8) rPPG signals.
    predictions = jax.random.normal(k1, (2, 8), dtype=jnp.float32)
    targets = jax.random.normal(k2, (2, 8), dtype=jnp.float32)

    loss_fn = jax.jit(neg_pearson_loss_mtts)
    loss = loss_fn(predictions, targets)
    jax.block_until_ready(loss)

    def _ref(pp, tt):
        x = pp.reshape(-1).astype(jnp.float32)
        y = tt.reshape(-1).astype(jnp.float32)
        nn = jnp.float32(x.shape[0])
        num = nn * jnp.sum(x * y) - jnp.sum(x) * jnp.sum(y)
        den = jnp.sqrt((nn * jnp.sum(x * x) - jnp.sum(x) ** 2)
                       * (nn * jnp.sum(y * y) - jnp.sum(y) ** 2))
        return 1.0 - num / den

    assert jnp.allclose(loss, _ref(predictions, targets),
                        rtol=1e-5, atol=1e-5), (loss, _ref(predictions, targets))

    # Multi-block, zero-copy (no-pad) path: n = 4*512*512 is a multiple of 512.
    k3, k4 = jax.random.split(k2)
    p_big = jax.random.normal(k3, (4, 512, 512), dtype=jnp.float32)
    t_big = jax.random.normal(k4, (4, 512, 512), dtype=jnp.float32)
    loss_big = loss_fn(p_big, t_big)
    jax.block_until_ready(loss_big)
    assert jnp.allclose(loss_big, _ref(p_big, t_big),
                        rtol=1e-4, atol=1e-4), (loss_big, _ref(p_big, t_big))

    # Ragged length -> padded fallback path.
    k5, k6 = jax.random.split(k4)
    p_odd = jax.random.normal(k5, (4, 300, 300), dtype=jnp.float32)
    t_odd = jax.random.normal(k6, (4, 300, 300), dtype=jnp.float32)
    loss_odd = loss_fn(p_odd, t_odd)
    jax.block_until_ready(loss_odd)
    assert jnp.allclose(loss_odd, _ref(p_odd, t_odd),
                        rtol=1e-4, atol=1e-4), (loss_odd, _ref(p_odd, t_odd))

    print("KERNEL_OK")
</pallas_src>

<mosaic_0001>
module attributes {stable_mosaic.version = 11 : i64} {
  func.func @_partial_sums_kernel(%arg0: i32, %arg1: memref<8x128xf32, #tpu.memory_space<vmem>>, %arg2: memref<8x128xf32, #tpu.memory_space<vmem>>, %arg3: memref<1x8x128xf32, #tpu.memory_space<vmem>>) attributes {dimension_semantics = [#tpu.dimension_semantics<parallel>], iteration_bounds = array<i64: 1>, scalar_prefetch = 0 : i64, scratch_operands = 0 : i64, tpu.core_type = #tpu.core_type<tc>, window_params = [{transform_indices = @transform_0, window_bounds = array<i64: 8, 128>}, {transform_indices = @transform_1, window_bounds = array<i64: 8, 128>}, {transform_indices = @transform_2, window_bounds = array<i64: 1, 8, 128>}]} {
    %cst = arith.constant 0.000000e+00 : f32
    %0 = vector.broadcast %cst : f32 to vector<8x128xf32>
    %c0_i32 = arith.constant 0 : i32
    %c8_i32 = arith.constant 8 : i32
    %1 = arith.muli %c0_i32, %c8_i32 : i32
    %2 = tpu.assume_multiple %1, 8 : i32
    %3 = arith.index_cast %2 : i32 to index
    %c0 = arith.constant 0 : index
    %4 = vector.load %arg1[%3, %c0] : memref<8x128xf32, #tpu.memory_space<vmem>>, vector<8x128xf32>
    %5 = arith.index_cast %2 : i32 to index
    %c0_0 = arith.constant 0 : index
    %6 = vector.load %arg2[%5, %c0_0] : memref<8x128xf32, #tpu.memory_space<vmem>>, vector<8x128xf32>
    %7 = arith.addf %0, %4 : vector<8x128xf32>
    %8 = arith.addf %0, %6 : vector<8x128xf32>
    %9 = arith.mulf %4, %6 : vector<8x128xf32>
    %10 = arith.addf %0, %9 : vector<8x128xf32>
    %11 = arith.mulf %4, %4 : vector<8x128xf32>
    %12 = arith.addf %0, %11 : vector<8x128xf32>
    %13 = arith.mulf %6, %6 : vector<8x128xf32>
    %14 = arith.addf %0, %13 : vector<8x128xf32>
    %c1_i32 = arith.constant 1 : i32
    %15 = vector.shape_cast %7 : vector<8x128xf32> to vector<1x8x128xf32>
    %cst_1 = arith.constant dense<0.000000e+00> : vector<1xf32>
    %16 = vector.multi_reduction <add>, %15, %cst_1 [1, 2] : vector<1x8x128xf32> to vector<1xf32>
    %17 = vector.shape_cast %16 : vector<1xf32> to vector<1x1x1xf32>
    %18 = vector.extract %17[0, 0, 0] : f32 from vector<1x1x1xf32>
    %19 = vector.shape_cast %8 : vector<8x128xf32> to vector<1x8x128xf32>
    %cst_2 = arith.constant dense<0.000000e+00> : vector<1xf32>
    %20 = vector.multi_reduction <add>, %19, %cst_2 [1, 2] : vector<1x8x128xf32> to vector<1xf32>
    %21 = vector.shape_cast %20 : vector<1xf32> to vector<1x1x1xf32>
    %22 = vector.extract %21[0, 0, 0] : f32 from vector<1x1x1xf32>
    %23 = vector.shape_cast %10 : vector<8x128xf32> to vector<1x8x128xf32>
    %cst_3 = arith.constant dense<0.000000e+00> : vector<1xf32>
    %24 = vector.multi_reduction <add>, %23, %cst_3 [1, 2] : vector<1x8x128xf32> to vector<1xf32>
    %25 = vector.shape_cast %24 : vector<1xf32> to vector<1x1x1xf32>
    %26 = vector.extract %25[0, 0, 0] : f32 from vector<1x1x1xf32>
    %27 = vector.shape_cast %12 : vector<8x128xf32> to vector<1x8x128xf32>
    %cst_4 = arith.constant dense<0.000000e+00> : vector<1xf32>
    %28 = vector.multi_reduction <add>, %27, %cst_4 [1, 2] : vector<1x8x128xf32> to vector<1xf32>
    %29 = vector.shape_cast %28 : vector<1xf32> to vector<1x1x1xf32>
    %30 = vector.extract %29[0, 0, 0] : f32 from vector<1x1x1xf32>
    %31 = vector.shape_cast %14 : vector<8x128xf32> to vector<1x8x128xf32>
    %cst_5 = arith.constant dense<0.000000e+00> : vector<1xf32>
    %32 = vector.multi_reduction <add>, %31, %cst_5 [1, 2] : vector<1x8x128xf32> to vector<1xf32>
    %33 = vector.shape_cast %32 : vector<1xf32> to vector<1x1x1xf32>
    %34 = vector.extract %33[0, 0, 0] : f32 from vector<1x1x1xf32>
    %35 = tpu.iota {dimensions = array<i32: 2>} : vector<1x8x128xi32>
    %c0_i32_6 = arith.constant 0 : i32
    %36 = vector.broadcast %c0_i32_6 : i32 to vector<1x8x128xi32>
    %37 = arith.cmpi eq, %35, %36 : vector<1x8x128xi32>
    %cst_7 = arith.constant 0.000000e+00 : f32
    %38 = vector.broadcast %18 : f32 to vector<1x8x128xf32>
    %39 = vector.broadcast %cst_7 : f32 to vector<1x8x128xf32>
    %40 = arith.select %37, %38, %39 : vector<1x8x128xi1>, vector<1x8x128xf32>
    %c1_i32_8 = arith.constant 1 : i32
    %41 = vector.broadcast %c1_i32_8 : i32 to vector<1x8x128xi32>
    %42 = arith.cmpi eq, %35, %41 : vector<1x8x128xi32>
    %cst_9 = arith.constant 0.000000e+00 : f32
    %43 = vector.broadcast %22 : f32 to vector<1x8x128xf32>
    %44 = vector.broadcast %cst_9 : f32 to vector<1x8x128xf32>
    %45 = arith.select %42, %43, %44 : vector<1x8x128xi1>, vector<1x8x128xf32>
    %46 = arith.addf %40, %45 : vector<1x8x128xf32>
    %c2_i32 = arith.constant 2 : i32
    %47 = vector.broadcast %c2_i32 : i32 to vector<1x8x128xi32>
    %48 = arith.cmpi eq, %35, %47 : vector<1x8x128xi32>
    %cst_10 = arith.constant 0.000000e+00 : f32
    %49 = vector.broadcast %26 : f32 to vector<1x8x128xf32>
    %50 = vector.broadcast %cst_10 : f32 to vector<1x8x128xf32>
    %51 = arith.select %48, %49, %50 : vector<1x8x128xi1>, vector<1x8x128xf32>
    %52 = arith.addf %46, %51 : vector<1x8x128xf32>
    %c3_i32 = arith.constant 3 : i32
    %53 = vector.broadcast %c3_i32 : i32 to vector<1x8x128xi32>
    %54 = arith.cmpi eq, %35, %53 : vector<1x8x128xi32>
    %cst_11 = arith.constant 0.000000e+00 : f32
    %55 = vector.broadcast %30 : f32 to vector<1x8x128xf32>
    %56 = vector.broadcast %cst_11 : f32 to vector<1x8x128xf32>
    %57 = arith.select %54, %55, %56 : vector<1x8x128xi1>, vector<1x8x128xf32>
    %58 = arith.addf %52, %57 : vector<1x8x128xf32>
    %c4_i32 = arith.constant 4 : i32
    %59 = vector.broadcast %c4_i32 : i32 to vector<1x8x128xi32>
    %60 = arith.cmpi eq, %35, %59 : vector<1x8x128xi32>
    %cst_12 = arith.constant 0.000000e+00 : f32
    %61 = vector.broadcast %34 : f32 to vector<1x8x128xf32>
    %62 = vector.broadcast %cst_12 : f32 to vector<1x8x128xf32>
    %63 = arith.select %60, %61, %62 : vector<1x8x128xi1>, vector<1x8x128xf32>
    %64 = arith.addf %58, %63 : vector<1x8x128xf32>
    %c0_13 = arith.constant 0 : index
    %c0_14 = arith.constant 0 : index
    %c0_15 = arith.constant 0 : index
    %65 = vector.load %arg3[%c0_13, %c0_14, %c0_15] : memref<1x8x128xf32, #tpu.memory_space<vmem>>, vector<1x8x128xf32>
    tpu.vector_store %arg3[%c0_13, %c0_14, %c0_15], %64 {strides = array<i32>} : memref<1x8x128xf32, #tpu.memory_space<vmem>>, vector<1x8x128xf32>,
    return
  }
  func.func @transform_0(%arg0: i32) -> (i32, i32) {
    %c0_i32 = arith.constant 0 : i32
    %c0_i32_0 = arith.constant 0 : i32
    return %arg0, %c0_i32 : i32, i32
  }
  func.func @transform_1(%arg0: i32) -> (i32, i32) {
    %c0_i32 = arith.constant 0 : i32
    %c0_i32_0 = arith.constant 0 : i32
    return %arg0, %c0_i32 : i32, i32
  }
  func.func @transform_2(%arg0: i32) -> (i32, i32, i32) {
    %c0_i32 = arith.constant 0 : i32
    %c0_i32_0 = arith.constant 0 : i32
    %c0_i32_1 = arith.constant 0 : i32
    return %arg0, %c0_i32, %c0_i32_0 : i32, i32, i32
  }
}

</mosaic_0001>

<bundles_post_ra>
// kernel: neg_pearson_loss_mtts.1
= control target key start
LH: loop header
LB: loop body
LE: loop exit
PB: predicated region body
PF: predicated region fallthrough
CT: control target
= control target key end

     0   :  { %v66_v40 = vlaneseq  ;;  %s126_s0 = inlined_call_operand.vmem [shape: f32[8,128], index: 0, kind: input, shape index: {}]   ;;  %s127_s1 = inlined_call_operand.vmem [shape: f32[8,128], index: 1, kind: input, shape index: {}]   ;;  %s128_s2 = inlined_call_operand.vmem [shape: f32[1,8,128], index: 2, kind: output, shape index: {}]  }
   0x1   :  { %v11_v0 = vld [vmem:[%s126_s0] sm:$0xff] }
   0x2   :  { %v12_v1 = vld [vmem:[%s127_s1] sm:$0xff]  ;;  %21 = vadd.xlane.f32.xlu0 %v11_v0  ;;  %v17_v3 = vmul.f32 %v11_v0, %v11_v0  ;;  %v67_v41 = vand.u32 127, %v66_v40 }
   0x3   :  { %v15_v2 = vmul.f32 %v12_v1, %v11_v0  ;;  %v19_v4 = vmul.f32 %v12_v1, %v12_v1 }
   0x4   :  { %vm68_vm0 = vcmp.eq.s32.totalorder %v67_v41, 0  ;;  %vm71_vm1 = vcmp.eq.s32.totalorder %v67_v41, 1  ;;  %vm75_vm2 = vcmp.eq.s32.totalorder %v67_v41, 2  ;;  %vm79_vm3 = vcmp.eq.s32.totalorder %v67_v41, 3 }
   0x5   :  { %39 = vadd.xlane.f32.xlu1 %v15_v2  ;;  %vm83_vm4 = vcmp.eq.s32.totalorder %v67_v41, 4 }
   0x6   :  { %30 = vadd.xlane.f32.xlu0 %v12_v1 }
   0x9   :  { %48 = vadd.xlane.f32.xlu1 %v17_v3 }
   0xa   :  { %57 = vadd.xlane.f32.xlu0 %v19_v4 }
  0x8f   :  { %v22_v5 = vpop.xlane.xlu0 %21 }
  0x90   :  { %v23_v6 = vrot.slane %v22_v5, 4 }
  0x92   :  { %v40_v7 = vpop.xlane.xlu1 %39  ;;  %v24_v8 = vadd.f32 %v23_v6, %v22_v5 }
  0x93   :  { %v41_v9 = vrot.slane %v40_v7, 4  ;;  %v31_v10 = vpop.xlane.xlu0 %30 }
  0x94   :  { %v25_v11 = vrot.slane %v24_v8, 2  ;;  %v32_v13 = vrot.slane %v31_v10, 4 }
  0x95   :  { %v42_v12 = vadd.f32 %v41_v9, %v40_v7 }
  0x96   :  { %v49_v14 = vpop.xlane.xlu1 %48  ;;  %v33_v16 = vadd.f32 %v32_v13, %v31_v10  ;;  %v26_v18 = vadd.f32 %v25_v11, %v24_v8 }
  0x97   :  { %v43_v15 = vrot.slane %v42_v12, 2  ;;  %v50_v17 = vrot.slane %v49_v14, 4  ;;  %v58_v19 = vpop.xlane.xlu0 %57 }
  0x98   :  { %v34_v20 = vrot.slane %v33_v16, 2  ;;  %v59_v22 = vrot.slane %v58_v19, 4  ;;  %v27_v23 = vrot.slane %v26_v18, 1 }
  0x99   :  { %v51_v21 = vadd.f32 %v50_v17, %v49_v14  ;;  %v44_v24 = vadd.f32 %v43_v15, %v42_v12 }
  0x9a   :  { %v60_v26 = vadd.f32 %v59_v22, %v58_v19  ;;  %v28_v27 = vadd.f32 %v27_v23, %v26_v18  ;;  %v35_v28 = vadd.f32 %v34_v20, %v33_v16 }
  0x9b   :  { %v52_v25 = vrot.slane %v51_v21, 2  ;;  %v45_v29 = vrot.slane %v44_v24, 1 }
  0x9c   :  { %v61_v31 = vrot.slane %v60_v26, 2  ;;  %92 = vpush %v28_v27  ;;  %v36_v32 = vrot.slane %v35_v28, 1 }
  0x9d   :  { %v53_v30 = vadd.f32 %v52_v25, %v51_v21  ;;  %v46_v36 = vadd.f32 %v45_v29, %v44_v24 }
  0x9e   :  { %v62_v33 = vadd.f32 %v61_v31, %v60_v26  ;;  %v37_v34 = vadd.f32 %v36_v32, %v35_v28 }
  0x9f   :  { %v54_v35 = vrot.slane %v53_v30, 1 }
  0xa0   :  { %94 = vpush %v37_v34  ;;  %v63_v38 = vrot.slane %v62_v33, 1 }
  0xa1   :  { %v55_v37 = vadd.f32 %v54_v35, %v53_v30  ;;  %96 = vpush %v46_v36 }
  0xa2   :  { %v64_v39 = vadd.f32 %v63_v38, %v62_v33 }
  0xa3   :  { %98 = vpush %v55_v37 }
  0xa4   :  { %100 = vpush %v64_v39 }
  0xcd   :  { %s93_s0 = spop %92 }
  0xce   :  { %v69_v42 = vstv %s93_s0 }
  0xcf   :  { %v70_v44 = vsel %vm68_vm0, %v69_v42, 0.0 }
  0xd1   :  { %s95_s1 = spop %94 }
  0xd2   :  { %v72_v43 = vstv %s95_s1  ;;  %s97_s13 = spop %96 }
  0xd3   :  { %v73_v45 = vsel %vm71_vm1, %v72_v43, 0.0  ;;  %v76_v46 = vstv %s97_s13 }
  0xd4   :  { %s99_s14 = spop %98  ;;  %v74_v47 = vadd.f32 %v73_v45, %v70_v44  ;;  %v77_v49 = vsel %vm75_vm2, %v76_v46, 0.0 }
  0xd5   :  { %v80_v48 = vstv %s99_s14  ;;  %s101_s15 = spop %100 }
  0xd6   :  { %v78_v50 = vadd.f32 %v77_v49, %v74_v47  ;;  %v84_v51 = vstv %s101_s15  ;;  %v81_v52 = vsel %vm79_vm3, %v80_v48, 0.0 }
  0xd7   :  { %v85_v54 = vsel %vm83_vm4, %v84_v51, 0.0 }
  0xd8   :  { %v82_v53 = vadd.f32 %v81_v52, %v78_v50 }
  0xda   :  { %v86_v55 = vadd.f32 %v85_v54, %v82_v53 }
  0xdc   :  { %87 = vst [vmem:[%s128_s2] sm:$0xff] %v86_v55 }

</bundles_post_ra>
